<compile_context>
chip_gen: v6e
topology: v6e:2x2x1
jax: 0.10.0
libtpu: 0.0.40
codegen_flags: <defaults>
</compile_context>

<pallas_src>
import math

import jax
import jax.numpy as jnp
from jax import lax
from jax.experimental import pallas as pl
from jax.experimental.pallas import tpu as pltpu

BN_EPS = 1e-5
CPAD = 128                     # lane width: channel dim padded to 128 everywhere
_ROLL_FWD = None               # True iff pltpu.roll matches np.roll (probed once)


# ---------------------------------------------------------------------------
# pltpu.roll convention probe (one tiny kernel, run once outside jit)
# ---------------------------------------------------------------------------
def _probe_roll_convention():
    x = jnp.broadcast_to(jnp.arange(128, dtype=jnp.int32), (8, 128))

    def k(x_ref, o_ref):
        o_ref[...] = pltpu.roll(x_ref[...], shift=1, axis=1)

    out = pl.pallas_call(
        k, out_shape=jax.ShapeDtypeStruct((8, 128), jnp.int32))(x)
    return int(out[0, 1]) == 0        # np.roll: out[:, 1] == in[:, 0] == 0


def ensure_roll_convention():
    global _ROLL_FWD
    if _ROLL_FWD is None:
        _ROLL_FWD = _probe_roll_convention()


def _lane_shift(v, off):
    """np.roll(v, off, axis=1) semantics regardless of pltpu.roll convention."""
    if off == 0:
        return v
    shift = off if _ROLL_FWD else (v.shape[1] - off) % v.shape[1]
    return pltpu.roll(v, shift=shift, axis=1)


# ---------------------------------------------------------------------------
# In-kernel building blocks
# ---------------------------------------------------------------------------
def _num_groups(cin):
    tpg = CPAD // cin
    return -(-9 // tpg)        # ceil(9 / taps_per_group)


def _conv3x3_dense(read_tap, w_ref, cin):
    """3x3 conv as a single MXU dot with the 9 taps packed densely into K.

    read_tap(t) returns an (M, 128) bf16 tile whose real input channels live in
    lanes [0:cin] with exact zeros elsewhere.  Tap t is lane-shifted to offset
    (t % tpg) * cin inside its 128-lane group (zeros wrap harmlessly), groups
    are summed and concatenated (lane-aligned), and the whole stack contracts
    against a pre-packed (n_groups*128, 128) weight in ONE dot, so tap
    accumulation happens inside the MXU (no f32 accumulator RMW in VMEM).
    """
    tpg = CPAD // cin
    groups = []
    for g in range(_num_groups(cin)):
        acc = None
        for j in range(min(tpg, 9 - g * tpg)):
            v = read_tap(g * tpg + j).astype(jnp.float32)
            v = _lane_shift(v, j * cin)
            acc = v if acc is None else acc + v
        groups.append(acc)
    col = groups[0] if len(groups) == 1 else jnp.concatenate(groups, axis=1)
    return jnp.dot(col.astype(jnp.bfloat16), w_ref[...],
                   preferred_element_type=jnp.float32)


def _s1_taps(src_ref, h, w):
    """Unit-stride tap reader over a spatially padded (BT, h+2, w+2, 128) ref."""
    bt = src_ref.shape[0]
    m = bt * h * w

    def read(t):
        kh, kw = divmod(t, 3)
        return src_ref[:, kh:kh + h, kw:kw + w, :].reshape(m, CPAD)

    return read, m


def _s2_taps(p_refs, oh, ow):
    """Stride-2 tap reader over the four even/odd phase sub-grids."""
    bt = p_refs[0].shape[0]
    m = bt * oh * ow

    def read(t):
        kh, kw = divmod(t, 3)
        p = p_refs[(kh % 2) * 2 + (kw % 2)]
        return p[:, kh // 2:kh // 2 + oh, kw // 2:kw // 2 + ow, :].reshape(m, CPAD)

    return read, m


def _zero_halo(ref):
    """Zero only the 1-pixel spatial halo; the interior is fully overwritten."""
    bt, hp, wp, c = ref.shape
    ref[:, 0, :, :] = jnp.zeros((bt, wp, c), ref.dtype)
    ref[:, hp - 1, :, :] = jnp.zeros((bt, wp, c), ref.dtype)
    ref[:, :, 0, :] = jnp.zeros((bt, hp, c), ref.dtype)
    ref[:, :, wp - 1, :] = jnp.zeros((bt, hp, c), ref.dtype)


def _store_interior(ref, val_f32):
    bt, hp, wp, c = ref.shape
    h, w = hp - 2, wp - 2
    # TODO(synk): interior store starts at sublane offset 1 (masked vst); an
    # 8-aligned left halo would make it a fully dense store.
    ref[:, 1:h + 1, 1:w + 1, :] = val_f32.reshape(bt, h, w, c).astype(ref.dtype)


def _basic_block_s1(a_ref, h_ref, w1_ref, b1_ref, w2_ref, b2_ref, planes):
    """Stride-1 BasicBlock (identity residual), entirely in VMEM."""
    bt, hp, wp, _ = a_ref.shape
    h, w = hp - 2, wp - 2
    read_a, m = _s1_taps(a_ref, h, w)
    c1 = jnp.maximum(_conv3x3_dense(read_a, w1_ref, planes) + b1_ref[...], 0.0)
    _store_interior(h_ref, c1)
    read_h, _ = _s1_taps(h_ref, h, w)
    res = a_ref[:, 1:h + 1, 1:w + 1, :].reshape(m, CPAD).astype(jnp.float32)
    out = jnp.maximum(
        _conv3x3_dense(read_h, w2_ref, planes) + b2_ref[...] + res, 0.0)
    _store_interior(a_ref, out)


def _basic_block_s2(p_refs, a_ref, h_ref, w1_ref, b1_ref, w2_ref, b2_ref,
                    wd_ref, bd_ref, inplanes, planes):
    """Stride-2 BasicBlock with a 1x1/stride-2 + BN downsample residual."""
    bt, hp, wp, _ = a_ref.shape
    oh, ow = hp - 2, wp - 2
    read_p, m = _s2_taps(p_refs, oh, ow)
    c1 = jnp.maximum(_conv3x3_dense(read_p, w1_ref, inplanes) + b1_ref[...], 0.0)
    _store_interior(h_ref, c1)
    read_h, _ = _s1_taps(h_ref, oh, ow)
    # 1x1 stride-2 downsample: x[:, ::2, ::2] is exactly phase (1, 1).
    xs = p_refs[3][:, 0:oh, 0:ow, :].reshape(m, CPAD)
    res = (jnp.dot(xs, wd_ref[...], preferred_element_type=jnp.float32)
           + bd_ref[...])
    out = jnp.maximum(
        _conv3x3_dense(read_h, w2_ref, planes) + b2_ref[...] + res, 0.0)
    _store_interior(a_ref, out)


def _make_layer_kernel(n_blocks, inplanes, planes, with_stem, with_head):
    """Fused per-layer kernel.

    with_stem : stem conv+bn+relu then n_blocks stride-1 blocks  (layer1)
    else      : one stride-2 block (from phase inputs) then n_blocks-1 s1 blocks
    with_head : append AvgPool2d + fc and emit logits instead of the activation
    """
    n_data = 1 if with_stem else 4

    def kernel(*refs):
        data = refs[:n_data]
        idx = n_data
        if with_stem:
            sw_ref, sb_ref = refs[idx:idx + 2]
            idx += 2
        blocks = []
        for b in range(n_blocks):
            take = 4 if (with_stem or b > 0) else 6
            blocks.append(refs[idx:idx + take])
            idx += take
        if with_head:
            fcw_ref, fcb_ref = refs[idx:idx + 2]
            idx += 2
        o_ref, a_ref, h_ref = refs[idx:idx + 3]

        bt, hp, wp, _ = a_ref.shape
        h, w = hp - 2, wp - 2
        _zero_halo(a_ref)
        _zero_halo(h_ref)

        if with_stem:
            read_x, _ = _s1_taps(data[0], h, w)
            stem = jnp.maximum(
                _conv3x3_dense(read_x, sw_ref, 3) + sb_ref[...], 0.0)
            _store_interior(a_ref, stem)

        for b, brefs in enumerate(blocks):
            if (not with_stem) and b == 0:
                w1, b1, w2, b2, wd, bd = brefs
                _basic_block_s2(data, a_ref, h_ref, w1, b1, w2, b2, wd, bd,
                                inplanes, planes)
            else:
                w1, b1, w2, b2 = brefs
                _basic_block_s1(a_ref, h_ref, w1, b1, w2, b2, planes)

        if with_head:
            x = a_ref[:, 1:h + 1, 1:w + 1, :].astype(jnp.float32)
            pooled = jnp.mean(x.reshape(bt, h * w, CPAD), axis=1)
            logits = (jnp.dot(pooled.astype(jnp.bfloat16), fcw_ref[...],
                              preferred_element_type=jnp.float32)
                      + fcb_ref[...])
            o_ref[...] = logits.reshape(bt, 1, CPAD)
        else:
            o_ref[...] = a_ref[...]        # halo already zero -> dense store

    return kernel


# ---------------------------------------------------------------------------
# pallas_call wrapper (grid over batch tiles; "parallel" for megacore)
# ---------------------------------------------------------------------------
def _run_layer(kernel, data, weights, out_tail, out_dtype, bt, hp, wp, n):
    def tile_spec(arr):
        nd = arr.ndim
        return pl.BlockSpec((bt,) + arr.shape[1:],
                            lambda i, _nd=nd: (i,) + (0,) * (_nd - 1))

    def full_spec(arr):
        nd = arr.ndim
        return pl.BlockSpec(arr.shape, lambda i, _nd=nd: (0,) * _nd)

    out_nd = 1 + len(out_tail)
    return pl.pallas_call(
        kernel,
        out_shape=jax.ShapeDtypeStruct((n,) + out_tail, out_dtype),
        grid=(n // bt,),
        in_specs=[tile_spec(a) for a in data] + [full_spec(w) for w in weights],
        out_specs=pl.BlockSpec((bt,) + out_tail,
                               lambda i, _nd=out_nd: (i,) + (0,) * (_nd - 1)),
        scratch_shapes=[pltpu.VMEM((bt, hp, wp, CPAD), jnp.bfloat16),
                        pltpu.VMEM((bt, hp, wp, CPAD), jnp.bfloat16)],
        compiler_params=pltpu.CompilerParams(
            dimension_semantics=("parallel",),
            vmem_limit_bytes=32 * 1024 * 1024),
    )(*data, *weights)


def _pick_batch_tile(n, max_bt=4):
    for bt in range(min(max_bt, n), 0, -1):
        if n % bt == 0:
            return bt
    return 1


# ---------------------------------------------------------------------------
# Deterministic parameters (matching the PyTorch module's initializers)
# ---------------------------------------------------------------------------
def _bn_fold(cout):
    gamma = jnp.ones((cout,), jnp.float32)
    beta = jnp.zeros((cout,), jnp.float32)
    mean = jnp.zeros((cout,), jnp.float32)
    var = jnp.ones((cout,), jnp.float32)
    scale = gamma * lax.rsqrt(var + BN_EPS)
    bias = beta - mean * scale
    return scale, bias


def _pad_bias(bias):
    return jnp.zeros((1, CPAD), jnp.float32).at[0, :bias.shape[0]].set(bias)


def _pack_conv3x3(w_hwio, scale):
    """(3,3,cin,cout) -> (n_groups*128, 128) bf16, taps packed densely along K:
    row = (t // tpg) * 128 + (t % tpg) * cin + c, with t = kh*3 + kw."""
    cin, cout = w_hwio.shape[2], w_hwio.shape[3]
    tpg = CPAD // cin
    kp = _num_groups(cin) * CPAD
    ws = w_hwio * scale[None, None, None, :]
    m = jnp.zeros((kp, CPAD), jnp.float32)
    for kh in range(3):
        for kw in range(3):
            t = kh * 3 + kw
            r0 = (t // tpg) * CPAD + (t % tpg) * cin
            m = m.at[r0:r0 + cin, :cout].set(ws[kh, kw])
    return m.astype(jnp.bfloat16)


def _pack_conv1x1(w_io, scale):
    cin, cout = w_io.shape
    m = jnp.zeros((CPAD, CPAD), jnp.float32)
    m = m.at[:cin, :cout].set(w_io * scale[None, :])
    return m.astype(jnp.bfloat16)


def init_params(key, depth=20, num_classes=10):
    """Returns (kernel_params, reference_params)."""
    assert (depth - 2) % 6 == 0, "BasicBlock depth must be 6n+2"
    n = (depth - 2) // 6
    keys = iter(jax.random.split(key, 8 * depth))

    def conv3x3(cin, cout):
        std = math.sqrt(2.0 / (9 * cout))
        w = std * jax.random.normal(next(keys), (3, 3, cin, cout), jnp.float32)
        w = w.astype(jnp.bfloat16).astype(jnp.float32)       # kernels use bf16
        scale, bias = _bn_fold(cout)
        return ({"p": _pack_conv3x3(w, scale), "b": _pad_bias(bias)},
                {"w": w, "scale": scale, "bias": bias})

    def conv1x1(cin, cout):
        std = math.sqrt(2.0 / cout)
        w = std * jax.random.normal(next(keys), (cin, cout), jnp.float32)
        w = w.astype(jnp.bfloat16).astype(jnp.float32)
        scale, bias = _bn_fold(cout)
        return ({"p": _pack_conv1x1(w, scale), "b": _pad_bias(bias)},
                {"w": w.reshape(1, 1, cin, cout), "scale": scale, "bias": bias})

    kstem, rstem = conv3x3(3, 16)
    kparams = {"stem_w": kstem["p"], "stem_b": kstem["b"]}
    rparams = {"stem": rstem}

    inplanes = 16
    for lname, planes, stride in (("layer1", 16, 1), ("layer2", 32, 2),
                                  ("layer3", 64, 2)):
        kblocks, rblocks = [], []
        for b in range(n):
            s = stride if b == 0 else 1
            kc1, rc1 = conv3x3(inplanes, planes)
            kc2, rc2 = conv3x3(planes, planes)
            kblk = {"w1": kc1["p"], "b1": kc1["b"],
                    "w2": kc2["p"], "b2": kc2["b"]}
            rblk = {"c1": rc1, "c2": rc2, "stride": s}
            if s != 1 or inplanes != planes:
                kcd, rcd = conv1x1(inplanes, planes)
                kblk["wd"], kblk["bd"] = kcd["p"], kcd["b"]
                rblk["cd"] = rcd
            kblocks.append(kblk)
            rblocks.append(rblk)
            inplanes = planes
        kparams[lname] = kblocks
        rparams[lname] = rblocks

    bound = 1.0 / math.sqrt(64)                     # nn.Linear default init
    fcw = jax.random.uniform(next(keys), (64, num_classes), jnp.float32,
                             -bound, bound).astype(jnp.bfloat16).astype(jnp.float32)
    fcb = jax.random.uniform(next(keys), (num_classes,), jnp.float32,
                             -bound, bound)
    kparams["fc_w"] = (jnp.zeros((CPAD, CPAD), jnp.float32)
                       .at[:64, :num_classes].set(fcw).astype(jnp.bfloat16))
    kparams["fc_b"] = _pad_bias(fcb)
    rparams["fc_w"], rparams["fc_b"] = fcw, fcb
    return kparams, rparams


# ---------------------------------------------------------------------------
# Forward pass (Pallas) and pure-JAX reference
# ---------------------------------------------------------------------------
def resnet_forward(x_nchw, params, num_classes=10):
    assert _ROLL_FWD is not None, "call ensure_roll_convention() before tracing"
    n_blocks = len(params["layer1"])
    x = jnp.transpose(x_nchw, (0, 2, 3, 1)).astype(jnp.float32)   # NCHW -> NHWC
    n, h, w, cin = x.shape
    bt = _pick_batch_tile(n)

    # single glue pad: 1-pixel halo + lane-dense channel pad, bf16 carry
    xp = jnp.pad(x, ((0, 0), (1, 1), (1, 1), (0, CPAD - cin))).astype(jnp.bfloat16)

    # stage 1: stem + layer1 -> spatially padded bf16 activation
    w1 = [params["stem_w"], params["stem_b"]]
    for blk in params["layer1"]:
        w1 += [blk["w1"], blk["b1"], blk["w2"], blk["b2"]]
    k1 = _make_layer_kernel(n_blocks, 16, 16, with_stem=True, with_head=False)
    act = _run_layer(k1, [xp], w1, (h + 2, w + 2, CPAD), jnp.bfloat16,
                     bt, h + 2, w + 2, n)

    # stage 2: layer2 (even/odd phase split is the only glue; unit-stride taps)
    h, w = h // 2, w // 2
    phases = [act[:, rh::2, rw::2, :] for rh in (0, 1) for rw in (0, 1)]
    w2 = []
    for i, blk in enumerate(params["layer2"]):
        w2 += [blk["w1"], blk["b1"], blk["w2"], blk["b2"]]
        if i == 0:
            w2 += [blk["wd"], blk["bd"]]
    k2 = _make_layer_kernel(n_blocks, 16, 32, with_stem=False, with_head=False)
    act = _run_layer(k2, phases, w2, (h + 2, w + 2, CPAD), jnp.bfloat16,
                     bt, h + 2, w + 2, n)

    # stage 3: layer3 + AvgPool2d(8) + fc fused into one kernel
    h, w = h // 2, w // 2
    phases = [act[:, rh::2, rw::2, :] for rh in (0, 1) for rw in (0, 1)]
    w3 = []
    for i, blk in enumerate(params["layer3"]):
        w3 += [blk["w1"], blk["b1"], blk["w2"], blk["b2"]]
        if i == 0:
            w3 += [blk["wd"], blk["bd"]]
    w3 += [params["fc_w"], params["fc_b"]]
    k3 = _make_layer_kernel(n_blocks, 32, 64, with_stem=False, with_head=True)
    logits = _run_layer(k3, phases, w3, (1, CPAD), jnp.float32,
                        bt, h + 2, w + 2, n)
    return logits[:, 0, :num_classes]


def _reference_forward(x_nchw, rp, num_classes=10):
    """Pure-JAX f32 reference of the same network (numeric validation)."""
    x = jnp.transpose(x_nchw, (0, 2, 3, 1)).astype(jnp.float32)

    def conv_bn(x, c, stride, relu):
        pad = c["w"].shape[0] // 2
        y = lax.conv_general_dilated(
            x, c["w"], (stride, stride), [(pad, pad), (pad, pad)],
            dimension_numbers=("NHWC", "HWIO", "NHWC"))
        y = y * c["scale"] + c["bias"]
        return jnp.maximum(y, 0.0) if relu else y

    x = conv_bn(x, rp["stem"], 1, True)
    for lname in ("layer1", "layer2", "layer3"):
        for blk in rp[lname]:
            res = x
            out = conv_bn(x, blk["c1"], blk["stride"], True)
            out = conv_bn(out, blk["c2"], 1, False)
            if "cd" in blk:
                res = conv_bn(x, blk["cd"], blk["stride"], False)
            x = jnp.maximum(out + res, 0.0)
    pooled = jnp.mean(x, axis=(1, 2))
    return pooled @ rp["fc_w"] + rp["fc_b"]


if __name__ == "__main__":
    key = jax.random.PRNGKey(0)
    pkey, xkey = jax.random.split(key)
    kparams, rparams = init_params(pkey, depth=20, num_classes=10)
    # PyTorch-convention NCHW input; 32x32 spatial is what AvgPool2d(8) implies.
    x = jax.random.normal(xkey, (2, 3, 32, 32), jnp.float32)

    ensure_roll_convention()           # tiny probe kernel, run once outside jit

    fwd = jax.jit(lambda inp: resnet_forward(inp, kparams, num_classes=10))
    logits = fwd(x)
    jax.block_until_ready(logits)
    assert logits.shape == (2, 10) and logits.dtype == jnp.float32

    # numeric sanity check vs. pure-JAX f32 reference (bf16 carry -> loose tol)
    ref = _reference_forward(x, rparams, num_classes=10)
    err = float(jnp.max(jnp.abs(logits - ref)))
    tol = 5e-2 + 5e-2 * float(jnp.max(jnp.abs(ref)))
    if not (err <= tol):
        raise AssertionError(
            f"Pallas forward deviates from reference: max|d|={err:.4f} > tol={tol:.4f}")
    print("KERNEL_OK")
</pallas_src>

<mosaic_0001>
module attributes {stable_mosaic.version = 11 : i64} {
  func.func @k(%arg0: memref<8x128xi32, #tpu.memory_space<vmem>>, %arg1: memref<8x128xi32, #tpu.memory_space<vmem>>) attributes {dimension_semantics = [], scalar_prefetch = 0 : i64, scratch_operands = 0 : i64, tpu.core_type = #tpu.core_type<tc>} {
    %c0 = arith.constant 0 : index
    %c0_0 = arith.constant 0 : index
    %0 = vector.load %arg0[%c0, %c0_0] : memref<8x128xi32, #tpu.memory_space<vmem>>, vector<8x128xi32>
    %c1_i32 = arith.constant 1 : i32
    %1 = tpu.dynamic_rotate %0 by %c1_i32 dim 1 : vector<8x128xi32>, i32 -> vector<8x128xi32>
    %c0_1 = arith.constant 0 : index
    %c0_2 = arith.constant 0 : index
    %2 = vector.load %arg1[%c0_1, %c0_2] : memref<8x128xi32, #tpu.memory_space<vmem>>, vector<8x128xi32>
    tpu.vector_store %arg1[%c0_1, %c0_2], %1 {strides = array<i32>} : memref<8x128xi32, #tpu.memory_space<vmem>>, vector<8x128xi32>,
    return
  }
}

</mosaic_0001>

<bundles_post_ra>
// kernel: tpu_custom_call.1
= control target key start
LH: loop header
LB: loop body
LE: loop exit
PB: predicated region body
PF: predicated region fallthrough
CT: control target
= control target key end

     0   :  { %6 = vsyncpa [#allocation3], 0  ;;  %s106_s0 = inlined_call_operand.hbm [shape: s32[8,128], index: 0, kind: input, shape index: {}]   ;;  %s107_s1 = inlined_call_operand.hbm [shape: s32[8,128], index: 1, kind: output, shape index: {}]  }
   0x1   :  { %7 = vsyncpa [#allocation4], 0  ;;  %s87_s6 = smov [#allocation2]  }
   0x2   :  { %s14_s7 = sshll.u32 %s87_s6, 4  ;;  %s15_s7 = int_to_ptr.vmem [resolvable:$true] %s14_s7 }
   0x3   :  { %s51_s8 = scalar_lea.vmem %s15_s7, 128  ;;  %p56_p1 = scmp.lt.s32.totalorder %s15_s7, %s15_s7 }
   0x4   :  { %p52_p0 = scmp.ne.s32.totalorder %s15_s7, %s51_s8  ;;  %p57_p2 = scmp.lt.s32.totalorder %s51_s8, %s51_s8 }
   0x6   :  { %p58_p3 = por %p57_p2, %p56_p1 }
   0x8   :  { %p59_p4 = pnand %p58_p3, %p52_p0 }
   0xa   :  { %62 = shalt.err (!%p59_p4)
}
   0xb   :  { %17 = dma.hbm_to_vmem [thread:$0]  %s106_s0, 128, %s15_s7, [#allocation3]  }
   0xc   :  { %83 = dma.done.wait [#allocation3], 128  }
   0xd   :  { %84 = vsyncadd [#allocation3], 4294967168  ;;  %v21_v0 = vld [vmem:[#allocation2] sm:$0xff]  ;;  %s88_s11 = smov 1   ;;  %s89_s12 = smov [#allocation5]  }
   0xe   :  { %22 = vrot.lane.b32.xlu0 %v21_v0, %s88_s11  ;;  %s31_s13 = sshll.u32 %s89_s12, 4  ;;  %s32_s13 = int_to_ptr.vmem [resolvable:$true] %s31_s13 }
   0xf   :  { %s63_s14 = scalar_lea.vmem %s32_s13, 128  ;;  %p68_p6 = scmp.lt.s32.totalorder %s32_s13, %s32_s13 }
  0x10   :  { %p64_p5 = scmp.ne.s32.totalorder %s32_s13, %s63_s14  ;;  %p69_p7 = scmp.lt.s32.totalorder %s63_s14, %s63_s14 }
  0x12   :  { %p70_p8 = por %p69_p7, %p68_p6 }
  0x14   :  { %p71_p9 = pnand %p70_p8, %p64_p5 }
  0x80   :  { %v23_v1 = vpop.permute.xlu0 %22 }
  0x81   :  { %24 = vst [vmem:[#allocation5] sm:$0xff] %v23_v1 }
  0x82   :  { %74 = shalt.err (!%p71_p9)
}
  0x83   :  { %34 = dma.vmem_to_hbm [thread:$0]  %s32_s13, 128, %s107_s1, [#allocation4]  }
  0x84   :  { %85 = dma.done.wait [#allocation4], 128  }
  0x85   :  { %86 = vsyncadd [#allocation4], 4294967168 }
  0x86   :  { %38 = vsyncpa [#allocation3], 1 }
  0x87   :  { %39 = vsyncpa [#allocation4], 1 }

</bundles_post_ra>
